<compile_context>
chip_gen: v7x
topology: tpu7x:2x2x1
jax: 0.10.0
libtpu: 0.0.40
codegen_flags: <defaults>
</compile_context>

<pallas_src>
import functools

import jax
import jax.numpy as jnp
from jax.experimental import pallas as pl
from jax.experimental.pallas import tpu as pltpu


def _round_up(x, m):
    return (x + m - 1) // m * m


def _physical_vmem_bytes():
    """Per-core VMEM capacity; conservative fallback (v7x = 64 MiB/TC)."""
    try:
        return int(pltpu.get_tpu_info().vmem_capacity_bytes)
    except Exception:
        return 64 << 20


def _bert_self_output_kernel(x_ref, res_ref, w_ref, p_ref, o_ref, *, eps, inv_h):
    # Dense: y = x @ W^T without any host-side transpose.  PyTorch weight is (out, in),
    # so contract x's dim 1 with W's dim 1; operands keep their native dtype (bf16 stays
    # bf16), accumulation is f32 on the MXU.
    y = jax.lax.dot_general(
        x_ref[...], w_ref[...],
        dimension_numbers=(((1,), (1,)), ((), ())),
        preferred_element_type=jnp.float32)

    # Packed parameters (3, H): row 0 = dense bias, row 1 = LN gamma, row 2 = LN beta.
    p = p_ref[...].astype(jnp.float32)
    b = p[0:1, :]
    g = p[1:2, :]
    beta = p[2:3, :]

    # dropout == identity at inference; residual add with the dense bias folded in.
    z = y + (res_ref[...].astype(jnp.float32) + b)

    # LayerNorm over hidden: single pass (E[z], E[z^2]) in f32, clamped variance.
    mean = jnp.sum(z, axis=-1, keepdims=True) * inv_h
    mean_sq = jnp.sum(z * z, axis=-1, keepdims=True) * inv_h
    var = jnp.maximum(mean_sq - mean * mean, 0.0)
    normed = (z - mean) * jax.lax.rsqrt(var + eps)

    o_ref[...] = (normed * g + beta).astype(o_ref.dtype)


def bert_self_output(hidden_states, input_tensor, weight, bias, gamma, beta,
                     *, eps=1e-12, tm=None, vmem_budget_bytes=None):
    """Fused BertSelfOutput forward.

    hidden_states, input_tensor: (B, S, H); weight: (H, H) in PyTorch (out, in) layout;
    bias/gamma/beta: (H,).  Dropout is identity (inference).
    """
    B, S, H = hidden_states.shape
    M = B * S
    out_dtype = hidden_states.dtype

    # Uniform MXU operand dtype: bf16 activations -> bf16 weight (one tiny HxH cast,
    # negligible vs. the activation traffic it removes from the matmul path).
    if weight.dtype != hidden_states.dtype:
        weight = weight.astype(hidden_states.dtype)

    x_bytes = jnp.dtype(hidden_states.dtype).itemsize
    w_bytes = jnp.dtype(weight.dtype).itemsize
    # Row-tile alignment: 8 sublanes for 32-bit, 16 for bf16, 32 for 8-bit.
    row_align = 8 if x_bytes >= 4 else (16 if x_bytes == 2 else 32)

    # --- VMEM budget / default tile per generation ---------------------------
    phys_vmem = _physical_vmem_bytes()
    if vmem_budget_bytes is None:
        vmem_budget_bytes = int(phys_vmem * 0.6)          # ~38 MiB on v7x, ~77 MiB on v5e/v6e
    vmem_budget_bytes = max(16 << 20,
                            min(vmem_budget_bytes, phys_vmem - (16 << 20)))
    if tm is None:
        tm = 2048 if phys_vmem >= (100 << 20) else 1024   # bigger tiles where VMEM allows

    # TODO(synk): single-buffer the grid-invariant weight with
    # pl.BlockSpec(..., pipeline_mode=pl.Buffered(1)) once the target JAX/Mosaic version
    # is confirmed to accept it; until then the estimate charges two weight buffers.
    def vmem_estimate(t):
        row_tiles = 3 * t * H * x_bytes          # x, residual, output tiles
        f32_tmp = 3 * t * H * 4                  # y / z / normed f32 intermediates
        return (2 * H * H * w_bytes              # resident weight (double-buffered)
                + 2 * row_tiles                  # double-buffered row tiles
                + f32_tmp
                + 2 * 8 * H * 4                  # packed (3,H) params, sublane-padded
                + (2 << 20))                     # compiler scratch slack

    # --- Row-tile selection ---------------------------------------------------
    tm_eff = max(row_align,
                 min(_round_up(tm, row_align), _round_up(M, row_align)))
    while tm_eff > row_align and vmem_estimate(tm_eff) > vmem_budget_bytes:
        tm_eff = max(row_align, _round_up(tm_eff // 2, row_align))

    # v7x has 2 TensorCores per chip: never leave one idle with a 1-step grid.
    if M > row_align and pl.cdiv(M, tm_eff) < 2:
        tm_eff = max(row_align, _round_up(pl.cdiv(M, 2), row_align))

    grid = (pl.cdiv(M, tm_eff),)                 # ragged M handled by the partial last block

    x2 = hidden_states.reshape(M, H)
    r2 = input_tensor.reshape(M, H)
    params = jnp.stack([bias.astype(jnp.float32),
                        gamma.astype(jnp.float32),
                        beta.astype(jnp.float32)], axis=0)      # (3, H)

    vmem_limit = int(min(max(vmem_estimate(tm_eff) + (4 << 20), 32 << 20),
                         phys_vmem - (8 << 20)))

    cost = pl.CostEstimate(
        flops=2 * M * H * H,
        transcendentals=M,                                       # one rsqrt per row
        bytes_accessed=3 * M * H * x_bytes + H * H * w_bytes + 3 * H * 4)

    kernel = functools.partial(_bert_self_output_kernel, eps=eps, inv_h=1.0 / H)

    out2 = pl.pallas_call(
        kernel,
        out_shape=jax.ShapeDtypeStruct((M, H), out_dtype),
        grid=grid,
        in_specs=[
            pl.BlockSpec((tm_eff, H), lambda i: (i, 0)),   # hidden_states rows
            pl.BlockSpec((tm_eff, H), lambda i: (i, 0)),   # residual rows
            pl.BlockSpec((H, H), lambda i: (0, 0)),        # dense weight (out, in), resident
            pl.BlockSpec((3, H), lambda i: (0, 0)),        # packed bias/gamma/beta
        ],
        out_specs=pl.BlockSpec((tm_eff, H), lambda i: (i, 0)),
        compiler_params=pltpu.CompilerParams(
            dimension_semantics=("parallel",),
            vmem_limit_bytes=vmem_limit),
        cost_estimate=cost,
    )(x2, r2, weight, params)

    return out2.reshape(B, S, H)


if __name__ == "__main__":
    # Small shapes consistent with the module: batch=2, seq=8, hidden=128.
    B, S, H = 2, 8, 128
    eps = 1e-12

    key = jax.random.PRNGKey(0)
    k_hs, k_res, k_w, k_b = jax.random.split(key, 4)

    hidden_states = jax.random.normal(k_hs, (B, S, H), dtype=jnp.float32)
    input_tensor = jax.random.normal(k_res, (B, S, H), dtype=jnp.float32)

    # Deterministic synthetic parameters (nn.Linear(H, H), BertLayerNorm(H)).
    weight = jax.random.normal(k_w, (H, H), dtype=jnp.float32) / jnp.sqrt(H)
    bias = jax.random.normal(k_b, (H,), dtype=jnp.float32) * 0.02
    gamma = jnp.ones((H,), dtype=jnp.float32) * 1.1
    beta = jnp.ones((H,), dtype=jnp.float32) * 0.05

    def ref_fn(hs, res):
        hs = hs.astype(jnp.float32)
        res = res.astype(jnp.float32)
        y = hs @ weight.T + bias
        z = y + res
        mu = jnp.mean(z, axis=-1, keepdims=True)
        va = jnp.mean((z - mu) ** 2, axis=-1, keepdims=True)
        return (z - mu) / jnp.sqrt(va + eps) * gamma + beta

    # 1) f32 path.
    out = bert_self_output(hidden_states, input_tensor, weight, bias, gamma, beta,
                           eps=eps)
    jax.block_until_ready(out)
    assert out.shape == (B, S, H)
    assert jnp.allclose(out, ref_fn(hidden_states, input_tensor),
                        atol=1e-4, rtol=1e-4), "mismatch vs reference (f32)"

    # 2) Ragged row count (B*S not a multiple of the row tile) — no host pad/slice.
    S2 = 7
    hs2 = jax.random.normal(jax.random.PRNGKey(1), (B, S2, H), dtype=jnp.float32)
    res2 = jax.random.normal(jax.random.PRNGKey(2), (B, S2, H), dtype=jnp.float32)
    out2 = bert_self_output(hs2, res2, weight, bias, gamma, beta, eps=eps)
    jax.block_until_ready(out2)
    assert out2.shape == (B, S2, H)
    assert jnp.allclose(out2, ref_fn(hs2, res2),
                        atol=1e-4, rtol=1e-4), "mismatch vs reference (ragged)"

    # 3) bf16 activations: MXU operands stay bf16 (weight cast once), f32 epilogue.
    hs_bf = hidden_states.astype(jnp.bfloat16)
    res_bf = input_tensor.astype(jnp.bfloat16)
    out_bf = bert_self_output(hs_bf, res_bf, weight, bias, gamma, beta, eps=eps)
    jax.block_until_ready(out_bf)
    assert out_bf.dtype == jnp.bfloat16 and out_bf.shape == (B, S, H)
    assert jnp.allclose(out_bf.astype(jnp.float32), ref_fn(hs_bf, res_bf),
                        atol=1e-1, rtol=1e-1), "mismatch vs reference (bf16)"

    print("KERNEL_OK")
</pallas_src>

<mosaic_0001>
module attributes {stable_mosaic.version = 11 : i64} {
  func.func @_bert_self_output_kernel(%arg0: i32, %arg1: memref<8x128xf32, #tpu.memory_space<vmem>>, %arg2: memref<8x128xf32, #tpu.memory_space<vmem>>, %arg3: memref<128x128xf32, #tpu.memory_space<vmem>>, %arg4: memref<3x128xf32, #tpu.memory_space<vmem>>, %arg5: memref<8x128xf32, #tpu.memory_space<vmem>>) attributes {dimension_semantics = [#tpu.dimension_semantics<parallel>], iteration_bounds = array<i64: 2>, scalar_prefetch = 0 : i64, scratch_operands = 0 : i64, tpu.core_type = #tpu.core_type<tc>, window_params = [{transform_indices = @transform_0, window_bounds = array<i64: 8, 128>}, {transform_indices = @transform_1, window_bounds = array<i64: 8, 128>}, {pipeline_mode = #tpu.pipeline_mode<synchronous>, transform_indices = @transform_2, window_bounds = array<i64: 128, 128>}, {pipeline_mode = #tpu.pipeline_mode<synchronous>, transform_indices = @transform_3, window_bounds = array<i64: 3, 128>}, {transform_indices = @transform_4, window_bounds = array<i64: 8, 128>}]} {
    %c0 = arith.constant 0 : index
    %c0_0 = arith.constant 0 : index
    %0 = vector.load %arg1[%c0, %c0_0] : memref<8x128xf32, #tpu.memory_space<vmem>>, vector<8x128xf32>
    %c0_1 = arith.constant 0 : index
    %c0_2 = arith.constant 0 : index
    %1 = vector.load %arg3[%c0_1, %c0_2] : memref<128x128xf32, #tpu.memory_space<vmem>>, vector<128x128xf32>
    %cst = arith.constant dense<0.000000e+00> : vector<8x128xf32>
    %2 = tpu.matmul %0, %1, %cst {dimension_numbers = #tpu.dot_dimension_numbers<[1], [1], [0], [0], [0, 0, 1, 0], [], []>} : vector<8x128xf32>, vector<128x128xf32>, vector<8x128xf32> -> vector<8x128xf32>
    %c0_3 = arith.constant 0 : index
    %c0_4 = arith.constant 0 : index
    %3 = vector.load %arg4[%c0_3, %c0_4] : memref<3x128xf32, #tpu.memory_space<vmem>>, vector<3x128xf32>
    %4 = vector.extract_strided_slice %3 {offsets = [0, 0], sizes = [1, 128], strides = [1, 1]} : vector<3x128xf32> to vector<1x128xf32>
    %5 = vector.extract_strided_slice %3 {offsets = [1, 0], sizes = [1, 128], strides = [1, 1]} : vector<3x128xf32> to vector<1x128xf32>
    %6 = vector.extract_strided_slice %3 {offsets = [2, 0], sizes = [1, 128], strides = [1, 1]} : vector<3x128xf32> to vector<1x128xf32>
    %c0_5 = arith.constant 0 : index
    %c0_6 = arith.constant 0 : index
    %7 = vector.load %arg2[%c0_5, %c0_6] : memref<8x128xf32, #tpu.memory_space<vmem>>, vector<8x128xf32>
    %8 = vector.broadcast %4 : vector<1x128xf32> to vector<8x128xf32>
    %9 = arith.addf %7, %8 : vector<8x128xf32>
    %10 = arith.addf %2, %9 : vector<8x128xf32>
    %cst_7 = arith.constant dense<0.000000e+00> : vector<8xf32>
    %11 = vector.multi_reduction <add>, %10, %cst_7 [1] : vector<8x128xf32> to vector<8xf32>
    %12 = vector.shape_cast %11 : vector<8xf32> to vector<8x1xf32>
    %cst_8 = arith.constant 7.812500e-03 : f32
    %13 = vector.broadcast %cst_8 : f32 to vector<8x1xf32>
    %14 = arith.mulf %12, %13 : vector<8x1xf32>
    %15 = arith.mulf %10, %10 : vector<8x128xf32>
    %cst_9 = arith.constant dense<0.000000e+00> : vector<8xf32>
    %16 = vector.multi_reduction <add>, %15, %cst_9 [1] : vector<8x128xf32> to vector<8xf32>
    %17 = vector.shape_cast %16 : vector<8xf32> to vector<8x1xf32>
    %cst_10 = arith.constant 7.812500e-03 : f32
    %18 = vector.broadcast %cst_10 : f32 to vector<8x1xf32>
    %19 = arith.mulf %17, %18 : vector<8x1xf32>
    %20 = arith.mulf %14, %14 : vector<8x1xf32>
    %21 = arith.subf %19, %20 : vector<8x1xf32>
    %cst_11 = arith.constant 0.000000e+00 : f32
    %22 = vector.broadcast %cst_11 : f32 to vector<8x1xf32>
    %23 = arith.maximumf %21, %22 : vector<8x1xf32>
    %24 = vector.broadcast %14 : vector<8x1xf32> to vector<8x128xf32>
    %25 = arith.subf %10, %24 : vector<8x128xf32>
    %cst_12 = arith.constant 9.99999996E-13 : f32
    %26 = vector.broadcast %cst_12 : f32 to vector<8x1xf32>
    %27 = arith.addf %23, %26 : vector<8x1xf32>
    %28 = math.rsqrt %27 : vector<8x1xf32>
    %29 = vector.broadcast %28 : vector<8x1xf32> to vector<8x128xf32>
    %30 = arith.mulf %25, %29 : vector<8x128xf32>
    %31 = vector.broadcast %5 : vector<1x128xf32> to vector<8x128xf32>
    %32 = arith.mulf %30, %31 : vector<8x128xf32>
    %33 = vector.broadcast %6 : vector<1x128xf32> to vector<8x128xf32>
    %34 = arith.addf %32, %33 : vector<8x128xf32>
    %c0_13 = arith.constant 0 : index
    %c0_14 = arith.constant 0 : index
    %35 = vector.load %arg5[%c0_13, %c0_14] : memref<8x128xf32, #tpu.memory_space<vmem>>, vector<8x128xf32>
    tpu.vector_store %arg5[%c0_13, %c0_14], %34 {strides = array<i32>} : memref<8x128xf32, #tpu.memory_space<vmem>>, vector<8x128xf32>,
    return
  }
  func.func @transform_0(%arg0: i32) -> (i32, i32) {
    %c0_i32 = arith.constant 0 : i32
    %c0_i32_0 = arith.constant 0 : i32
    return %arg0, %c0_i32 : i32, i32
  }
  func.func @transform_1(%arg0: i32) -> (i32, i32) {
    %c0_i32 = arith.constant 0 : i32
    %c0_i32_0 = arith.constant 0 : i32
    return %arg0, %c0_i32 : i32, i32
  }
  func.func @transform_2(%arg0: i32) -> (i32, i32) {
    %c0_i32 = arith.constant 0 : i32
    %c0_i32_0 = arith.constant 0 : i32
    %c0_i32_1 = arith.constant 0 : i32
    return %c0_i32, %c0_i32_0 : i32, i32
  }
  func.func @transform_3(%arg0: i32) -> (i32, i32) {
    %c0_i32 = arith.constant 0 : i32
    %c0_i32_0 = arith.constant 0 : i32
    %c0_i32_1 = arith.constant 0 : i32
    return %c0_i32, %c0_i32_0 : i32, i32
  }
  func.func @transform_4(%arg0: i32) -> (i32, i32) {
    %c0_i32 = arith.constant 0 : i32
    %c0_i32_0 = arith.constant 0 : i32
    return %arg0, %c0_i32 : i32, i32
  }
}

</mosaic_0001>

<bundles_post_ra>
// kernel: tpu_custom_call.1
= control target key start
LH: loop header
LB: loop body
LE: loop exit
PB: predicated region body
PF: predicated region fallthrough
CT: control target
= control target key end

     0   :  { %s1101_s0 = inlined_call_operand.hbm [shape: f32[16,128], index: 0, kind: input, shape index: {}]   ;;  %s1102_s1 = inlined_call_operand.hbm [shape: f32[16,128], index: 1, kind: input, shape index: {}]   ;;  %s1103_s2 = inlined_call_operand.hbm [shape: f32[128,128], index: 2, kind: input, shape index: {}]   ;;  %s1104_s3 = inlined_call_operand.vmem [shape: f32[3,128], index: 3, kind: input, shape index: {}]   ;;  %s1105_s4 = inlined_call_operand.hbm [shape: f32[16,128], index: 4, kind: output, shape index: {}]  }
   0x1   :  { %1110 = sst [smem:[#allocation13_spill]] %s1103_s2 }
   0x2   :  { %9 = vsyncpa [#allocation3], 0 }
   0x3   :  { %11 = vsyncpa [#allocation3 + $0x1], 0 }
   0x4   :  { %12 = vsyncpa [#allocation6], 0 }
   0x5   :  { %14 = vsyncpa [#allocation6 + $0x1], 0 }
   0x6   :  { %15 = vsyncpa [#allocation4], 0 }
   0x7   :  { %17 = vsyncpa [#allocation4 + $0x1], 0  ;;  %s859_s15 = smov 0   ;;  %s861_s16 = smov 0  }
   0x8   :  { %s863_s17 = smov 0   ;;  %s865_s18 = smov 0  }
   0x9 LB: > { %s880_s19 = sadd.s32 4294967295, %s823_s18   ;;  %s499_s20 = sadd.s32 4294967294, %s823_s18   ;;  %s823_s18 = sphi %s865_s18, %s1129_s18   ;;  %s819_s17 = sphi %s863_s17, %s1128_s17   ;;  %s815_s16 = sphi %s861_s16, %s1127_s16   ;;  %s811_s15 = sphi %s859_s15, %s1126_s15  }
   0xa   : > { %p43_p0 = scmp.ne.s32.totalorder %s815_s16, %s811_s15  ;;  %p1106_p1 = scmp.eq.s32.totalorder %s880_s19, 0 }
   0xb   : > { %p141_p3 = scmp.eq.s32.totalorder %s499_s20, 1  ;;  %p500_p5 = scmp.ge.s32.totalorder %s823_s18, 1 }
   0xc   : > { %p889_p4 = por %p1106_p1, %p43_p0  ;;  %p148_p7 = scmp.lt.s32.totalorder %s823_s18, 3 }
   0xd   : > { %p894_p6 = por %p141_p3, %p43_p0  ;;  %s825_s24 = smov [#allocation7]  }
   0xe   : > { %s1111_s21 = scalar_select %p889_p4, 1, 0 }
   0xf   : > { %s1112_s22 = scalar_select %p894_p6, 1, 0 }
  0x10   : > { %p899_p8 = pnand %p500_p5, %p148_p7  ;;  %s160_s25 = sshll.u32 %s825_s24, 4  ;;  %s903_s25 = int_to_ptr.vmem [resolvable:$true] %s160_s25 }
  0x11   : > { %s915_s27 = sadd.s32 1, %s823_s18   ;;  %s30_s28 = sadd.s32 1, %s819_s17 }
  0x12   : > { %s1113_s23 = scalar_select %p899_p8, 1, 0 }
  0x13   : > { %p602_p9 = pneg %p899_p8  ;;  %s27_s29 = ssub.s32 %s823_s18, %s915_s27 }
  0x14   : > { %s1115_s2 = sld [smem:[#allocation13_spill]] }
  0x15   : > { %p910_p11 = pnand %p602_p9, %p1106_p1 }
  0x17   : > { %p663_p13 = pneg %p910_p11 }
  0x1a   : > { %s661_s6 = scalar_lea.hbm %s1115_s2, 2048 }
  0x1b   : > { %p662_p12 = scmp.ne.s32.totalorder %s1115_s2, %s661_s6  ;;  %p668_p5 = scmp.lt.u32.totalorder %s661_s6, %s1115_s2 }
  0x1d   : > { %p664_p0 = pnand %p663_p13, %p662_p12 }
  0x1f   : > { %p665_p3 = pneg %p664_p0 }
  0x21   : > { %p670_p7 = pnand %p668_p5, %p665_p3 }
  0x23   : > { %673 = shalt.err (!%p670_p7)
}
  0x24   : > { %s674_s11 = scalar_lea.vmem %s903_s25, 2048  ;;  %p682_p2 = scmp.lt.s32.totalorder %s903_s25, %s903_s25 }
  0x25   : > { %p675_p9 = scmp.ne.s32.totalorder %s903_s25, %s674_s11  ;;  %p683_p6 = scmp.lt.s32.totalorder %s674_s11, %s674_s11 }
  0x27   : > { %p677_p10 = pnand %p675_p9, %p663_p13  ;;  %p684_p4 = por %p683_p6, %p682_p2 }
  0x29   : > { %p678_p1 = pneg %p677_p10 }
  0x2b   : > { %p685_p8 = pnand %p684_p4, %p678_p1 }
  0x2d   : > { %688 = shalt.err (!%p685_p8)
}
  0x2e   : > { %s826_s12 = smov 128   ;;  %s827_s13 = smov 8  }
  0x2f   : > { %605 = dma.hbm_to_vmem [thread:$0]  (!%p910_p11), %s1115_s2, 2048, %s903_s25, [#allocation6], %s826_s12, %s826_s12, %s827_s13  }
  0x30   : > { %p28_p2 = scmp.eq.s32.totalorder %s27_s29, 0  ;;  %p37_p1 = scmp.ne.s32.totalorder %s819_s17, %s815_s16 }
  0x31   : > { %p38_p4 = scmp.eq.s32.totalorder %s823_s18, 0  ;;  %p618_p6 = scmp.lt.s32.totalorder %s823_s18, 2 }
  0x32   : > { %s946_s24 = scalar_select %p28_p2, %s819_s17, %s30_s28  }
  0x33   : > { %p39_p8 = por %p38_p4, %p37_p1  ;;  %p1116_p10 = scmp.eq.s32.totalorder %s880_s19, 1 }
  0x34   : > { %s177_s5 = sand.u32 1, %s819_s17   ;;  %s504_s6 = sshll.u32 %s823_s18, 7 }
  0x35   : > { %p950_p12 = por %p1116_p10, %p37_p1  ;;  %s956_s7 = sshll.u32 %s177_s5, 3 }
  0x36   : > { %s961_s25 = scalar_lea.hbm %s1101_s0, %s504_s6  ;;  %s181_s28 = scalar_lea.vmem [#allocation2], %s956_s7 }
  0x37   : > { %s1117_s30 = scalar_select %p950_p12, 1, 0 }
  0x38   : > { %s188_s29 = sshll.u32 %s181_s28, 4  ;;  %p964_p11 = pnand %p618_p6, %p39_p8  ;;  %s968_s29 = int_to_ptr.vmem [resolvable:$true] %s188_s29 }
  0x39   : > { %s973_s12 = scalar_lea.hbm %s1102_s1, %s504_s6  ;;  %s178_s13 = scalar_lea.sflag [#allocation3], %s177_s5 }
  0x3a   : > { %s689_s14 = scalar_lea.hbm %s961_s25, 128  ;;  %p691_p0 = pneg %p964_p11 }
  0x3b   : > { %p690_p13 = scmp.ne.s32.totalorder %s961_s25, %s689_s14  ;;  %s694_s8 = scalar_lea.hbm %s1101_s0, 256 }
  0x3c   : > { %p695_p7 = scmp.lt.u32.totalorder %s961_s25, %s1101_s0  ;;  %p696_p9 = scmp.lt.u32.totalorder %s694_s8, %s689_s14 }
  0x3d   : > { %p692_p3 = pnand %p691_p0, %p690_p13  ;;  %p698_p1 = scmp.lt.u32.totalorder %s689_s14, %s961_s25 }
  0x3e   : > { %p697_p2 = por %p696_p9, %p695_p7 }
  0x3f   : > { %p693_p5 = pneg %p692_p3 }
  0x40   : > { %p699_p4 = por %p698_p1, %p697_p2 }
  0x42   : > { %p700_p6 = pnand %p699_p4, %p693_p5 }
  0x44   : > { %703 = shalt.err (!%p700_p6)
}
  0x45   : > { %s704_s5 = scalar_lea.vmem %s968_s29, 128  ;;  %s828_s6 = smov [#allocation2]  }
  0x46   : > { %p705_p8 = scmp.ne.s32.totalorder %s968_s29, %s704_s5  ;;  %s709_s10 = sshll.u32 %s828_s6, 4  ;;  %s710_s10 = int_to_ptr.vmem [resolvable:$false] %s709_s10 }
  0x47   : > { %s711_s2 = scalar_lea.vmem %s710_s10, 256  ;;  %p712_p3 = scmp.lt.s32.totalorder %s968_s29, %s710_s10 }
  0x48   : > { %p707_p10 = pnand %p705_p8, %p691_p0  ;;  %p713_p7 = scmp.lt.s32.totalorder %s711_s2, %s704_s5 }
  0x4a   : > { %p708_p13 = pneg %p707_p10  ;;  %p714_p9 = por %p713_p7, %p712_p3 }
  0x4c   : > { %p715_p2 = pnand %p714_p9, %p708_p13 }
  0x4e   : > { %718 = shalt.err (!%p715_p2)
}
  0x4f   : > { %609 = dma.hbm_to_vmem [thread:$0]  (!%p964_p11), %s961_s25, 128, %s968_s29, %s178_s13  }
  0x50   : > { %s195_s11 = sand.u32 1, %s823_s18   ;;  %s199_s14 = scalar_lea.vmem [#allocation5], %s956_s7 }
  0x51   : > { %s206_s20 = sshll.u32 %s199_s14, 4  ;;  %s196_s26 = scalar_lea.sflag [#allocation6], %s195_s11  ;;  %s207_s20 = int_to_ptr.vmem [resolvable:$true] %s206_s20 }
  0x52   : > { %s719_s8 = scalar_lea.hbm %s973_s12, 128  ;;  %s724_s6 = scalar_lea.hbm %s1102_s1, 256 }
  0x53   : > { %p720_p5 = scmp.ne.s32.totalorder %s973_s12, %s719_s8  ;;  %p725_p6 = scmp.lt.u32.totalorder %s973_s12, %s1102_s1 }
  0x54   : > { %p726_p8 = scmp.lt.u32.totalorder %s724_s6, %s719_s8  ;;  %p728_p13 = scmp.lt.u32.totalorder %s719_s8, %s973_s12 }
  0x55   : > { %p722_p1 = pnand %p720_p5, %p691_p0 }
  0x56   : > { %p727_p10 = por %p726_p8, %p725_p6 }
  0x57   : > { %p723_p4 = pneg %p722_p1 }
  0x58   : > { %p729_p3 = por %p728_p13, %p727_p10 }
  0x5a   : > { %p730_p7 = pnand %p729_p3, %p723_p4 }
  0x5c   : > { %733 = shalt.err (!%p730_p7)
}
  0x5d   : > { %s734_s7 = scalar_lea.vmem %s207_s20, 128  ;;  %s829_s25 = smov [#allocation5]  }
  0x5e   : > { %p735_p9 = scmp.ne.s32.totalorder %s207_s20, %s734_s7  ;;  %s739_s29 = sshll.u32 %s829_s25, 4  ;;  %s740_s29 = int_to_ptr.vmem [resolvable:$false] %s739_s29 }
  0x5f   : > { %s741_s13 = scalar_lea.vmem %s740_s29, 256  ;;  %p742_p1 = scmp.lt.s32.totalorder %s207_s20, %s740_s29 }
  0x60   : > { %p737_p2 = pnand %p735_p9, %p691_p0  ;;  %p743_p12 = scmp.lt.s32.totalorder %s741_s13, %s734_s7 }
  0x62   : > { %p738_p5 = pneg %p737_p2  ;;  %p744_p6 = por %p743_p12, %p742_p1 }
  0x64   : > { %p745_p8 = pnand %p744_p6, %p738_p5 }
  0x66   : > { %748 = shalt.err (!%p745_p8)
}
  0x67   : > { %612 = dma.hbm_to_vmem [thread:$0]  (!%p964_p11), %s973_s12, 128, %s207_s20, %s196_s26  }
  0x68   : > { %p1119_p4 = scmp.ne.s32.totalorder %s1113_s23, 0 }
  0x69   : > { %s1024_s11 = sand.u32 (!%p1119_p4), 1, %s815_s16   ;;  %p1120_p12 = scmp.ne.s32.totalorder (!%p1119_p4), %s1111_s21, 0 }
  0x6a   : > { %215 = sbr.rel (%p1119_p4) target bundleno = 585 (0x249), region = 36  ;;  %s1027_s14 = sshll.u32 (!%p1119_p4), %s1024_s11, 3 }
  0x6b   : > { %s218_s8 = scalar_lea.sflag (!%p1119_p4), [#allocation3], %s1024_s11  ;;  %s221_s28 = scalar_lea.vmem (!%p1119_p4), [#allocation2], %s1027_s14 }
  0x71   : > { %794 = dma.done.wait (%p1120_p12), %s218_s8, 128  }
  0x72   : > { %796 = vsyncadd (%p1120_p12), %s218_s8, 4294967168  ;;  %s226_s23 = sand.u32 1, %s880_s19   ;;  %s230_s12 = scalar_lea.vmem [#allocation5], %s1027_s14 }
  0x73   : > { %s227_s9 = scalar_lea.sflag [#allocation6], %s226_s23 }
  0x74   : > { %798 = dma.done.wait (%p1120_p12), %s227_s9, 128  }
  0x75   : > { %800 = vsyncadd (%p1120_p12), %s227_s9, 4294967168  ;;  %p1121_p11 = scmp.eq.s32.totalorder %s880_s19, 0 }
  0x77   : > { %802 = dma.done.wait (%p1121_p11), [#allocation6], 2048   ;;  %p1122_p0 = pmov %p1121_p11 }
  0x78   : > { %v830_v0 = vmov 0.0|0.0   ;;  %vm831_vm0 = vmmov 0   ;;  %v832_v1 = vmov 0.0   ;;  %v265_v2 = vld [vmem:[#allocation7] sm:$0xff]  ;;  %v266_v3 = vld [vmem:[#allocation7 + $0x8] sm:$0xff]  ;;  %v267_v5 = vld [vmem:[#allocation7 + $0x10] sm:$0xff]  ;;  %v283_v27 = vlaneseq }
  0x79   : > { %804 = vsyncadd (%p1122_p0), [#allocation6], 4294965248  ;;  %568 = vmatprep.subr.bf16.mxu0 %v830_v0  ;;  %565 = vmatprep.mubr.msk.f32.mxu0 %vm831_vm0, %v832_v1  ;;  %v569_v4 = vpack.c.bf16 %v266_v3, %v265_v2  ;;  %v268_v6 = vld [vmem:[#allocation7 + $0x18] sm:$0xff]  ;;  %v269_v8 = vld [vmem:[#allocation7 + $0x20] sm:$0xff]  ;;  %s513_s26 = sshll.u32 %s880_s19, 7  ;;  %s263_s5 = scalar_lea.vmem [#allocation8], %s1027_s14 }
  0x7a   : > { %v572_v7 = vpack.c.bf16 %v268_v6, %v267_v5  ;;  %v270_v9 = vld [vmem:[#allocation7 + $0x28] sm:$0xff]  ;;  %v271_v11 = vld [vmem:[#allocation7 + $0x30] sm:$0xff]  ;;  %v272_v12 = vld [vmem:[#allocation7 + $0x38] sm:$0xff]  ;;  %v284_v28 = vshrl.u32 %v283_v27, 7  ;;  %s397_s6 = sshll.u32 %s263_s5, 4  ;;  %s1057_s7 = scalar_lea.hbm %s1105_s4, %s513_s26  ;;  %s1059_s6 = int_to_ptr.vmem [resolvable:$true] %s397_s6 }
  0x7b   : > { %570 = vmatpush3.bf16.xpose.msra.mxu0 %v569_v4  ;;  %v575_v10 = vpack.c.bf16 %v270_v9, %v269_v8  ;;  %v578_v13 = vpack.c.bf16 %v272_v12, %v271_v11  ;;  %v273_v14 = vld [vmem:[#allocation7 + $0x40] sm:$0xff]  ;;  %v274_v15 = vld [vmem:[#allocation7 + $0x48] sm:$0xff]  ;;  %v275_v17 = vld [vmem:[#allocation7 + $0x50] sm:$0xff]  ;;  %s384_s25 = scalar_lea.sflag [#allocation4], %s1024_s11  ;;  %s749_s29 = scalar_lea.vmem %s1059_s6, 128 }
  0x7c   : > { %571 = vmatprep.subr.bf16.mxu0 %v830_v0  ;;  %v581_v16 = vpack.c.bf16 %v274_v15, %v273_v14  ;;  %v276_v18 = vld [vmem:[#allocation7 + $0x58] sm:$0xff]  ;;  %v277_v20 = vld [vmem:[#allocation7 + $0x60] sm:$0xff]  ;;  %v278_v21 = vld [vmem:[#allocation7 + $0x68] sm:$0xff]  ;;  %v285_v29 = vsub.s32 0, %v284_v28  ;;  %v374_v46 = vsub.s32 1, %v284_v28  ;;  %v379_v47 = vsub.s32 2, %v284_v28  ;;  %p750_p10 = scmp.ne.s32.totalorder %s1059_s6, %s749_s29 }
  0x7d   : > { %v584_v19 = vpack.c.bf16 %v276_v18, %v275_v17  ;;  %v587_v22 = vpack.c.bf16 %v278_v21, %v277_v20  ;;  %v279_v23 = vld [vmem:[#allocation7 + $0x70] sm:$0xff]  ;;  %v280_v24 = vld [vmem:[#allocation7 + $0x78] sm:$0xff]  ;;  %v264_v26 = vld [vmem:[%s221_s28] sm:$0xff]  ;;  %p1123_p13 = scmp.ne.s32.totalorder %s1117_s30, 0  ;;  %s833_s19 = smov [#allocation8]  }
  0x7e   : > { %v590_v25 = vpack.c.bf16 %v280_v24, %v279_v23  ;;  %v281_v30 = vld [vmem:[%s1104_s3] sm:$0x7]  ;;  %v282_v32 = vld [vmem:[%s230_s12] sm:$0xff]  ;;  %s753_s13 = sshll.u32 %s833_s19, 4  ;;  %s754_s13 = int_to_ptr.vmem [resolvable:$false] %s753_s13 }
  0x7f   : > { %v286_v31 = vrot.slane %v281_v30, %v285_v29  ;;  %v375_v48 = vrot.slane %v281_v30, %v374_v46  ;;  %v380_v51 = vrot.slane %v281_v30, %v379_v47  ;;  %p751_p3 = pnand %p750_p10, %p1123_p13  ;;  %s755_s14 = scalar_lea.vmem %s754_s13, 256 }
  0x80   : > { %p756_p9 = scmp.lt.s32.totalorder %s1059_s6, %s754_s13  ;;  %p757_p2 = scmp.lt.s32.totalorder %s755_s14, %s749_s29 }
  0x81   : > { %v287_v33 = vadd.f32 %v286_v31, %v282_v32  ;;  %p752_p7 = pneg %p751_p3 }
  0x82   : > { %p758_p5 = por %p757_p2, %p756_p9 }
  0x83   : > { %573 = vmatpush3.bf16.xpose.msra.mxu0 %v572_v7 }
  0x84   : > { %574 = vmatprep.subr.bf16.mxu0 %v830_v0  ;;  %p759_p1 = pnand %p758_p5, %p752_p7 }
  0x8b   : > { %576 = vmatpush3.bf16.xpose.msra.mxu0 %v575_v10 }
  0x8c   : > { %577 = vmatprep.subr.bf16.mxu0 %v830_v0 }
  0x93   : > { %579 = vmatpush3.bf16.xpose.msra.mxu0 %v578_v13 }
  0x94   : > { %580 = vmatprep.subr.bf16.mxu0 %v830_v0 }
  0x9b   : > { %582 = vmatpush3.bf16.xpose.msra.mxu0 %v581_v16 }
  0x9c   : > { %583 = vmatprep.subr.bf16.mxu0 %v830_v0 }
  0xa3   : > { %585 = vmatpush3.bf16.xpose.msra.mxu0 %v584_v19 }
  0xa4   : > { %586 = vmatprep.subr.bf16.mxu0 %v830_v0 }
  0xab   : > { %588 = vmatpush3.bf16.xpose.msra.mxu0 %v587_v22 }
  0xac   : > { %589 = vmatprep.subr.bf16.mxu0 %v830_v0 }
  0xb3   : > { %591 = vmatpush3.bf16.xpose.msra.mxu0 %v590_v25 }
  0xba   : > { %566 = vmatmul.mubr.f32.vlgmr.msra.gmra.mrb[0].mxu0 %v264_v26 }
 0x18d   : > { %v354_v34 = vpop.f32.mrb[0].mxu0 }
 0x18e   : > { %v355_v35 = vadd.f32 %v354_v34, %v287_v33  ;;  %v567_v36 = vpop.f32.mrb[1].mxu0 }
 0x190   : > { %358 = vadd.xlane.f32.xlu0 %v355_v35  ;;  %v361_v37 = vmul.f32 %v355_v35, %v355_v35 }
 0x194   : > { %362 = vadd.xlane.f32.xlu0 %v361_v37 }
 0x21d   : > { %v359_v38 = vpop.xlane.xlu0 %358 }
 0x21e   : > { %v360_v39 = vmul.f32 0.0078125, %v359_v38 }
 0x220   : > { %v365_v41 = vmul.f32 %v360_v39, %v360_v39  ;;  %v368_v49 = vsub.f32 %v355_v35, %v360_v39 }
 0x221   : > { %v363_v40 = vpop.xlane.xlu0 %362 }
 0x222   : > { %v364_v42 = vmul.f32 0.0078125, %v363_v40 }
 0x224   : > { %v366_v43 = vsub.f32 %v364_v42, %v365_v41 }
 0x226   : > { %v367_v44 = vmax.f32 %v366_v43, 0.0 }
 0x228   : > { %v369_v45 = vadd.f32 1e-12, %v367_v44 }
 0x22a   : > { %659 = vrsqrt.f32 %v369_v45 }
 0x234   : > { %v660_v50 = vpop.eup %659 }
 0x235   : > { %v371_v52 = vmul.f32 %v660_v50, %v368_v49 }
 0x237   : > { %v376_v53 = vmul.f32 %v375_v48, %v371_v52 }
 0x239   : > { %v381_v54 = vadd.f32 %v380_v51, %v376_v53 }
 0x23b   : > { %382 = vst [vmem:[%s263_s5] sm:$0xff] %v381_v54 }
 0x23c   : > { %762 = shalt.err (!%p759_p1)
}
 0x23d   : > { %s763_s11 = scalar_lea.hbm %s1057_s7, 128  ;;  %s767_s23 = scalar_lea.hbm %s1105_s4, 256 }
 0x23e   : > { %p764_p6 = scmp.ne.s32.totalorder %s1057_s7, %s763_s11  ;;  %p768_p12 = scmp.lt.u32.totalorder %s1057_s7, %s1105_s4 }
 0x23f   : > { %p769_p11 = scmp.lt.u32.totalorder %s767_s23, %s763_s11  ;;  %p771_p10 = scmp.lt.u32.totalorder %s763_s11, %s1057_s7 }
 0x240   : > { %p765_p8 = pnand %p764_p6, %p1123_p13 }
 0x241   : > { %p770_p0 = por %p769_p11, %p768_p12 }
 0x242   : > { %p766_p4 = pneg %p765_p8 }
 0x243   : > { %p772_p3 = por %p771_p10, %p770_p0 }
 0x245   : > { %p773_p7 = pnand %p772_p3, %p766_p4 }
 0x247   : > { %776 = shalt.err (!%p773_p7)
}
 0x248   : > { %600 = dma.vmem_to_hbm [thread:$0]  (%p1123_p13), %s1059_s6, 128, %s1057_s7, %s384_s25  }
 0x249 PF: > { %s409_s21 = sand.u32 1, %s811_s15   ;;  %p1124_p9 = scmp.ne.s32.totalorder %s1112_s22, 0 }
 0x24a   : > { %p1125_p2 = scmp.ge.s32.totalorder %s823_s18, 2  ;;  %s410_s20 = scalar_lea.sflag [#allocation4], %s409_s21 }
 0x24c   : > { %p614_p5 = pnand %p1125_p2, %p1124_p9 }
 0x24e   : > { %806 = dma.done.wait (!%p614_p5), %s410_s20, 128  }
 0x24f   : > { %808 = vsyncadd (!%p614_p5), %s410_s20, 4294967168  ;;  %p20_p1 = scmp.ge.s32.totalorder %s915_s27, 4   ;;  %s1126_s15 = smov %s815_s16 }
 0x250   : > { %s1127_s16 = smov %s819_s17  ;;  %s1128_s17 = smov %s946_s24 }
 0x251   : > { %s1129_s18 = smov %s915_s27  ;;  %22 = sbr.rel (!%p20_p1) target bundleno = 9 (0x9), region = 98 }
 0x258   :  { %415 = vsyncpa [#allocation3], 1 }
 0x259   :  { %417 = vsyncpa [#allocation3 + $0x1], 1 }
 0x25a   :  { %418 = vsyncpa [#allocation6], 1 }
 0x25b   :  { %420 = vsyncpa [#allocation6 + $0x1], 1 }
 0x25c   :  { %421 = vsyncpa [#allocation4], 1 }
 0x25d   :  { %423 = vsyncpa [#allocation4 + $0x1], 1 }

</bundles_post_ra>
